<compile_context>
chip_gen: v7x
topology: tpu7x:2x2x1
jax: 0.10.0
libtpu: 0.0.40
codegen_flags: <defaults>
</compile_context>

<pallas_src>
import jax
import jax.numpy as jnp
from jax.experimental import pallas as pl
from jax.experimental.pallas import tpu as pltpu


def mlp_kernel(p_ref, x_ref, o_ref):
    # p_ref : SMEM (17,) f32 = [w1 (3x2 row-major), b1 (3,), w2 (2x3 row-major), b2 (2,)]
    # x_ref : VMEM (R, 128) f32 -- interleaved lanes: [x0,x1, x0,x1, ...] per sample
    # o_ref : VMEM (R, 128) f32 -- interleaved lanes: [o0,o1, o0,o1, ...] per sample
    x = x_ref[...]
    R, L = x.shape  # L == 128

    # Lane-parity mask: even lane holds feature 0 of its sample, odd holds feature 1.
    lane = jax.lax.broadcasted_iota(jnp.int32, (R, L), 1)
    even = (lane & 1) == 0

    # De-interleave with XLU lane rotations (jnp.roll semantics: result[l] = x[l-shift]).
    # Wrap-around lanes (0 / 127) are never selected by the `where`s below.
    x_next = pltpu.roll(x, L - 1, axis=1)   # lane l <- lane l+1
    x_prev = pltpu.roll(x, 1, axis=1)       # lane l <- lane l-1
    x0 = jnp.where(even, x, x_prev)         # feature 0 of own sample on every lane
    x1 = jnp.where(even, x_next, x)         # feature 1 of own sample on every lane

    # Hoisted scalar reads / splats (one per parameter per tile).
    w1_00 = p_ref[0]; w1_01 = p_ref[1]
    w1_10 = p_ref[2]; w1_11 = p_ref[3]
    w1_20 = p_ref[4]; w1_21 = p_ref[5]
    b1_0 = p_ref[6]; b1_1 = p_ref[7]; b1_2 = p_ref[8]

    def sigmoid(z):
        # Single-transcendental sigmoid: one EUP tanh + one VPU FMA.
        return 0.5 * jnp.tanh(0.5 * z) + 0.5

    # Hidden layer (unrolled VPU FMAs, no MXU).
    h0 = sigmoid(w1_00 * x0 + w1_01 * x1 + b1_0)
    h1 = sigmoid(w1_10 * x0 + w1_11 * x1 + b1_1)
    h2 = sigmoid(w1_20 * x0 + w1_21 * x1 + b1_2)

    # Output layer: even lanes compute output feature 0, odd lanes feature 1
    # (per-lane selected w2 row / b2), so each output element is computed once.
    w2_0 = jnp.where(even, p_ref[9],  p_ref[12])
    w2_1 = jnp.where(even, p_ref[10], p_ref[13])
    w2_2 = jnp.where(even, p_ref[11], p_ref[14])
    b2_s = jnp.where(even, p_ref[15], p_ref[16])

    o = sigmoid(w2_0 * h0 + w2_1 * h1 + w2_2 * h2 + b2_s)
    o_ref[...] = o.astype(o_ref.dtype)


def model_forward(x, w1, b1, w2, b2, *, target_block_rows=4096):
    """x: (B, 2).  w1: (3, 2) torch layout, b1: (3,), w2: (2, 3), b2: (2,)."""
    B = x.shape[0]
    x = jnp.asarray(x, jnp.float32)

    # Pack all 17 parameters into one SMEM scalar table.
    params = jnp.concatenate([
        jnp.asarray(w1, jnp.float32).reshape(-1),   # (6,)  w1[j,k] at 2*j+k
        jnp.asarray(b1, jnp.float32).reshape(-1),   # (3,)  at 6+j
        jnp.asarray(w2, jnp.float32).reshape(-1),   # (6,)  w2[j,k] at 9+3*j+k
        jnp.asarray(b2, jnp.float32).reshape(-1),   # (2,)  at 15+j
    ])                                              # (17,) f32

    # Interleaved, fully dense layout: (B, 2) row-major -> (rows, 128) slab
    # (64 samples per row).  Reshape is free for contiguous data; only padding
    # (when B is not block-aligned) costs an extra HBM pass.
    samples_per_row = 64
    rows_needed = pl.cdiv(B, samples_per_row)
    block_rows = min(target_block_rows, ((rows_needed + 7) // 8) * 8)
    rows_padded = pl.cdiv(rows_needed, block_rows) * block_rows
    Bp = rows_padded * samples_per_row
    if Bp != B:
        x = jnp.pad(x, ((0, Bp - B), (0, 0)))
    x_slab = x.reshape(rows_padded, 128)

    grid = (rows_padded // block_rows,)
    grid_spec = pltpu.PrefetchScalarGridSpec(
        num_scalar_prefetch=1,                      # params -> SMEM
        grid=grid,
        in_specs=[pl.BlockSpec((block_rows, 128), lambda i, p: (i, 0))],
        out_specs=pl.BlockSpec((block_rows, 128), lambda i, p: (i, 0)),
    )

    out_slab = pl.pallas_call(
        mlp_kernel,
        out_shape=jax.ShapeDtypeStruct((rows_padded, 128), jnp.float32),
        grid_spec=grid_spec,
        compiler_params=pltpu.CompilerParams(
            dimension_semantics=("parallel",),      # batch tiles shard across v7x TCs
            vmem_limit_bytes=32 * 1024 * 1024,      # headroom on v5e's 16 MiB default
        ),
    )(params, x_slab)

    # Free reshape back to (Bp, 2); drop padded samples.
    return out_slab.reshape(Bp, 2)[:B]


def reference_forward(x, w1, b1, w2, b2):
    h = jax.nn.sigmoid(x @ w1.T + b1)
    return jax.nn.sigmoid(h @ w2.T + b2)


if __name__ == "__main__":
    key = jax.random.PRNGKey(0)
    kx, k1, k2, k3, k4 = jax.random.split(key, 5)

    # PyTorch Linear default init: U(-1/sqrt(fan_in), 1/sqrt(fan_in)).
    w1 = jax.random.uniform(k1, (3, 2), jnp.float32, -(2 ** -0.5), 2 ** -0.5)
    b1 = jax.random.uniform(k2, (3,), jnp.float32, -(2 ** -0.5), 2 ** -0.5)
    w2 = jax.random.uniform(k3, (2, 3), jnp.float32, -(3 ** -0.5), 3 ** -0.5)
    b2 = jax.random.uniform(k4, (2,), jnp.float32, -(3 ** -0.5), 3 ** -0.5)

    # Small demo batch (single tile, padded path).
    B = 8
    x = jax.random.normal(kx, (B, 2), dtype=jnp.float32)
    out = model_forward(x, w1, b1, w2, b2)
    jax.block_until_ready(out)
    ref = reference_forward(x, w1, b1, w2, b2)
    assert out.shape == (B, 2)
    assert jnp.allclose(out, ref, atol=1e-4, rtol=1e-4)

    # Multi-tile grid path (small block to exercise several grid steps).
    B2 = 4096
    x2 = jax.random.normal(kx, (B2, 2), dtype=jnp.float32)
    out2 = model_forward(x2, w1, b1, w2, b2, target_block_rows=8)
    jax.block_until_ready(out2)
    ref2 = reference_forward(x2, w1, b1, w2, b2)
    assert out2.shape == (B2, 2)
    assert jnp.allclose(out2, ref2, atol=1e-4, rtol=1e-4)

    # TODO(synk): the torch module's ic(h)/ic(o) debug prints have no kernel
    # equivalent and are intentionally omitted.
    print("KERNEL_OK")
</pallas_src>

<mosaic_0001>
module attributes {stable_mosaic.version = 11 : i64} {
  func.func @mlp_kernel(%arg0: i32, %arg1: memref<17xf32, #tpu.memory_space<smem>>, %arg2: memref<8x128xf32, #tpu.memory_space<vmem>>, %arg3: memref<8x128xf32, #tpu.memory_space<vmem>>) attributes {dimension_semantics = [#tpu.dimension_semantics<parallel>], iteration_bounds = array<i64: 1>, scalar_prefetch = 1 : i64, scratch_operands = 0 : i64, tpu.core_type = #tpu.core_type<tc>, window_params = [{transform_indices = @transform_0, window_bounds = array<i64: 8, 128>}, {transform_indices = @transform_1, window_bounds = array<i64: 8, 128>}]} {
    %c0 = arith.constant 0 : index
    %c0_0 = arith.constant 0 : index
    %0 = vector.load %arg2[%c0, %c0_0] : memref<8x128xf32, #tpu.memory_space<vmem>>, vector<8x128xf32>
    %1 = tpu.iota {dimensions = array<i32: 1>} : vector<8x128xi32>
    %c1_i32 = arith.constant 1 : i32
    %2 = vector.broadcast %c1_i32 : i32 to vector<8x128xi32>
    %3 = arith.andi %1, %2 : vector<8x128xi32>
    %c0_i32 = arith.constant 0 : i32
    %4 = vector.broadcast %c0_i32 : i32 to vector<8x128xi32>
    %5 = arith.cmpi eq, %3, %4 : vector<8x128xi32>
    %c127_i32 = arith.constant 127 : i32
    %6 = tpu.dynamic_rotate %0 by %c127_i32 dim 1 : vector<8x128xf32>, i32 -> vector<8x128xf32>
    %c1_i32_1 = arith.constant 1 : i32
    %7 = tpu.dynamic_rotate %0 by %c1_i32_1 dim 1 : vector<8x128xf32>, i32 -> vector<8x128xf32>
    %8 = arith.select %5, %0, %7 : vector<8x128xi1>, vector<8x128xf32>
    %9 = arith.select %5, %6, %0 : vector<8x128xi1>, vector<8x128xf32>
    %c0_2 = arith.constant 0 : index
    %10 = memref.load %arg1[%c0_2] : memref<17xf32, #tpu.memory_space<smem>>
    %c1 = arith.constant 1 : index
    %11 = memref.load %arg1[%c1] : memref<17xf32, #tpu.memory_space<smem>>
    %c2 = arith.constant 2 : index
    %12 = memref.load %arg1[%c2] : memref<17xf32, #tpu.memory_space<smem>>
    %c3 = arith.constant 3 : index
    %13 = memref.load %arg1[%c3] : memref<17xf32, #tpu.memory_space<smem>>
    %c4 = arith.constant 4 : index
    %14 = memref.load %arg1[%c4] : memref<17xf32, #tpu.memory_space<smem>>
    %c5 = arith.constant 5 : index
    %15 = memref.load %arg1[%c5] : memref<17xf32, #tpu.memory_space<smem>>
    %c6 = arith.constant 6 : index
    %16 = memref.load %arg1[%c6] : memref<17xf32, #tpu.memory_space<smem>>
    %c7 = arith.constant 7 : index
    %17 = memref.load %arg1[%c7] : memref<17xf32, #tpu.memory_space<smem>>
    %c8 = arith.constant 8 : index
    %18 = memref.load %arg1[%c8] : memref<17xf32, #tpu.memory_space<smem>>
    %19 = vector.broadcast %10 : f32 to vector<8x128xf32>
    %20 = arith.mulf %19, %8 : vector<8x128xf32>
    %21 = vector.broadcast %11 : f32 to vector<8x128xf32>
    %22 = arith.mulf %21, %9 : vector<8x128xf32>
    %23 = arith.addf %20, %22 : vector<8x128xf32>
    %24 = vector.broadcast %16 : f32 to vector<8x128xf32>
    %25 = arith.addf %23, %24 : vector<8x128xf32>
    %cst = arith.constant 5.000000e-01 : f32
    %26 = vector.broadcast %cst : f32 to vector<8x128xf32>
    %27 = arith.mulf %26, %25 : vector<8x128xf32>
    %28 = math.tanh %27 : vector<8x128xf32>
    %cst_3 = arith.constant 5.000000e-01 : f32
    %29 = vector.broadcast %cst_3 : f32 to vector<8x128xf32>
    %30 = arith.mulf %29, %28 : vector<8x128xf32>
    %cst_4 = arith.constant 5.000000e-01 : f32
    %31 = vector.broadcast %cst_4 : f32 to vector<8x128xf32>
    %32 = arith.addf %30, %31 : vector<8x128xf32>
    %33 = vector.broadcast %12 : f32 to vector<8x128xf32>
    %34 = arith.mulf %33, %8 : vector<8x128xf32>
    %35 = vector.broadcast %13 : f32 to vector<8x128xf32>
    %36 = arith.mulf %35, %9 : vector<8x128xf32>
    %37 = arith.addf %34, %36 : vector<8x128xf32>
    %38 = vector.broadcast %17 : f32 to vector<8x128xf32>
    %39 = arith.addf %37, %38 : vector<8x128xf32>
    %cst_5 = arith.constant 5.000000e-01 : f32
    %40 = vector.broadcast %cst_5 : f32 to vector<8x128xf32>
    %41 = arith.mulf %40, %39 : vector<8x128xf32>
    %42 = math.tanh %41 : vector<8x128xf32>
    %cst_6 = arith.constant 5.000000e-01 : f32
    %43 = vector.broadcast %cst_6 : f32 to vector<8x128xf32>
    %44 = arith.mulf %43, %42 : vector<8x128xf32>
    %cst_7 = arith.constant 5.000000e-01 : f32
    %45 = vector.broadcast %cst_7 : f32 to vector<8x128xf32>
    %46 = arith.addf %44, %45 : vector<8x128xf32>
    %47 = vector.broadcast %14 : f32 to vector<8x128xf32>
    %48 = arith.mulf %47, %8 : vector<8x128xf32>
    %49 = vector.broadcast %15 : f32 to vector<8x128xf32>
    %50 = arith.mulf %49, %9 : vector<8x128xf32>
    %51 = arith.addf %48, %50 : vector<8x128xf32>
    %52 = vector.broadcast %18 : f32 to vector<8x128xf32>
    %53 = arith.addf %51, %52 : vector<8x128xf32>
    %cst_8 = arith.constant 5.000000e-01 : f32
    %54 = vector.broadcast %cst_8 : f32 to vector<8x128xf32>
    %55 = arith.mulf %54, %53 : vector<8x128xf32>
    %56 = math.tanh %55 : vector<8x128xf32>
    %cst_9 = arith.constant 5.000000e-01 : f32
    %57 = vector.broadcast %cst_9 : f32 to vector<8x128xf32>
    %58 = arith.mulf %57, %56 : vector<8x128xf32>
    %cst_10 = arith.constant 5.000000e-01 : f32
    %59 = vector.broadcast %cst_10 : f32 to vector<8x128xf32>
    %60 = arith.addf %58, %59 : vector<8x128xf32>
    %c9 = arith.constant 9 : index
    %61 = memref.load %arg1[%c9] : memref<17xf32, #tpu.memory_space<smem>>
    %c12 = arith.constant 12 : index
    %62 = memref.load %arg1[%c12] : memref<17xf32, #tpu.memory_space<smem>>
    %63 = vector.broadcast %61 : f32 to vector<8x128xf32>
    %64 = vector.broadcast %62 : f32 to vector<8x128xf32>
    %65 = arith.select %5, %63, %64 : vector<8x128xi1>, vector<8x128xf32>
    %c10 = arith.constant 10 : index
    %66 = memref.load %arg1[%c10] : memref<17xf32, #tpu.memory_space<smem>>
    %c13 = arith.constant 13 : index
    %67 = memref.load %arg1[%c13] : memref<17xf32, #tpu.memory_space<smem>>
    %68 = vector.broadcast %66 : f32 to vector<8x128xf32>
    %69 = vector.broadcast %67 : f32 to vector<8x128xf32>
    %70 = arith.select %5, %68, %69 : vector<8x128xi1>, vector<8x128xf32>
    %c11 = arith.constant 11 : index
    %71 = memref.load %arg1[%c11] : memref<17xf32, #tpu.memory_space<smem>>
    %c14 = arith.constant 14 : index
    %72 = memref.load %arg1[%c14] : memref<17xf32, #tpu.memory_space<smem>>
    %73 = vector.broadcast %71 : f32 to vector<8x128xf32>
    %74 = vector.broadcast %72 : f32 to vector<8x128xf32>
    %75 = arith.select %5, %73, %74 : vector<8x128xi1>, vector<8x128xf32>
    %c15 = arith.constant 15 : index
    %76 = memref.load %arg1[%c15] : memref<17xf32, #tpu.memory_space<smem>>
    %c16 = arith.constant 16 : index
    %77 = memref.load %arg1[%c16] : memref<17xf32, #tpu.memory_space<smem>>
    %78 = vector.broadcast %76 : f32 to vector<8x128xf32>
    %79 = vector.broadcast %77 : f32 to vector<8x128xf32>
    %80 = arith.select %5, %78, %79 : vector<8x128xi1>, vector<8x128xf32>
    %81 = arith.mulf %65, %32 : vector<8x128xf32>
    %82 = arith.mulf %70, %46 : vector<8x128xf32>
    %83 = arith.addf %81, %82 : vector<8x128xf32>
    %84 = arith.mulf %75, %60 : vector<8x128xf32>
    %85 = arith.addf %83, %84 : vector<8x128xf32>
    %86 = arith.addf %85, %80 : vector<8x128xf32>
    %cst_11 = arith.constant 5.000000e-01 : f32
    %87 = vector.broadcast %cst_11 : f32 to vector<8x128xf32>
    %88 = arith.mulf %87, %86 : vector<8x128xf32>
    %89 = math.tanh %88 : vector<8x128xf32>
    %cst_12 = arith.constant 5.000000e-01 : f32
    %90 = vector.broadcast %cst_12 : f32 to vector<8x128xf32>
    %91 = arith.mulf %90, %89 : vector<8x128xf32>
    %cst_13 = arith.constant 5.000000e-01 : f32
    %92 = vector.broadcast %cst_13 : f32 to vector<8x128xf32>
    %93 = arith.addf %91, %92 : vector<8x128xf32>
    %c0_14 = arith.constant 0 : index
    %c0_15 = arith.constant 0 : index
    %94 = vector.load %arg3[%c0_14, %c0_15] : memref<8x128xf32, #tpu.memory_space<vmem>>, vector<8x128xf32>
    tpu.vector_store %arg3[%c0_14, %c0_15], %93 {strides = array<i32>} : memref<8x128xf32, #tpu.memory_space<vmem>>, vector<8x128xf32>,
    return
  }
  func.func @transform_0(%arg0: i32, %arg1: memref<17xf32, #tpu.memory_space<smem>>) -> (i32, i32) {
    %c0_i32 = arith.constant 0 : i32
    %c0_i32_0 = arith.constant 0 : i32
    return %arg0, %c0_i32 : i32, i32
  }
  func.func @transform_1(%arg0: i32, %arg1: memref<17xf32, #tpu.memory_space<smem>>) -> (i32, i32) {
    %c0_i32 = arith.constant 0 : i32
    %c0_i32_0 = arith.constant 0 : i32
    return %arg0, %c0_i32 : i32, i32
  }
}

</mosaic_0001>

<bundles_post_ra>
// kernel: tpu_custom_call.1
= control target key start
LH: loop header
LB: loop body
LE: loop exit
PB: predicated region body
PF: predicated region fallthrough
CT: control target
= control target key end

     0   :  { %s286_s0 = inlined_call_operand.hbm [shape: f32[17], index: 0, kind: input, shape index: {}]   ;;  %s287_s1 = inlined_call_operand.hbm [shape: f32[8,128], index: 1, kind: input, shape index: {}]   ;;  %s288_s2 = inlined_call_operand.hbm [shape: f32[8,128], index: 2, kind: output, shape index: {}]  }
   0x1   :  { %s154_s11 = scalar_lea.hbm %s286_s0, 16 }
   0x2   :  { %p155_p0 = scmp.ne.s32.totalorder %s286_s0, %s154_s11  ;;  %p158_p1 = scmp.lt.u32.totalorder %s154_s11, %s286_s0 }
   0x4   :  { %p160_p2 = pnand %p158_p1, %p155_p0 }
   0x6   :  { %163 = shalt.err (!%p160_p2)  }
   0x7   :  { %s214_s16 = smov [#allocation3]  }
   0x8   :  { %8 = dma.hbm_to_smem %s286_s0, 16, %s214_s16, [#allocation2] }
   0x9   :  { %208 = dma.done.wait [#allocation2], 16 }
   0xa   :  { %209 = vsyncadd [#allocation2], 4294967280 }
   0xb   :  { %10 = sfence }
   0xc   :  { %11 = vsyncpa [#allocation5], 0 }
   0xd   :  { %12 = vsyncpa [#allocation6], 0  ;;  %s215_s19 = smov [#allocation4]   ;;  %s164_s23 = scalar_lea.hbm %s287_s1, 128 }
   0xe   :  { %s19_s20 = sshll.u32 %s215_s19, 4  ;;  %p165_p3 = scmp.ne.s32.totalorder %s287_s1, %s164_s23  ;;  %s20_s20 = int_to_ptr.vmem [resolvable:$true] %s19_s20 }
   0xf   :  { %p168_p4 = scmp.lt.u32.totalorder %s164_s23, %s287_s1 }
  0x11   :  { %p170_p5 = pnand %p168_p4, %p165_p3 }
  0x13   :  { %173 = shalt.err (!%p170_p5)
}
  0x14   :  { %s174_s0 = scalar_lea.vmem %s20_s20, 128  ;;  %p179_p7 = scmp.lt.s32.totalorder %s20_s20, %s20_s20 }
  0x15   :  { %p175_p6 = scmp.ne.s32.totalorder %s20_s20, %s174_s0  ;;  %p180_p8 = scmp.lt.s32.totalorder %s174_s0, %s174_s0 }
  0x17   :  { %p181_p9 = por %p180_p8, %p179_p7 }
  0x19   :  { %p182_p10 = pnand %p181_p9, %p175_p6 }
  0x1b   :  { %185 = shalt.err (!%p182_p10)
}
  0x1c   :  { %22 = dma.hbm_to_vmem [thread:$0]  %s287_s1, 128, %s20_s20, [#allocation5]  }
  0x1d   :  { %210 = dma.done.wait [#allocation5], 128  }
  0x1e   :  { %211 = vsyncadd [#allocation5], 4294967168  ;;  %v26_v0 = vld [vmem:[#allocation4] sm:$0xff]  ;;  %s216_s30 = smov 127   ;;  %s217_s3 = smov 1   ;;  %v27_v1 = vlaneseq }
  0x1f   :  { %31 = vrot.lane.b32.xlu0 %v26_v0, %s216_s30  ;;  %s125_s4 = sld [smem:[#allocation3 + $0x1]]  ;;  %s127_s5 = sld [smem:[#allocation3 + $0x3]] }
  0x20   :  { %v28_v2 = vand.u32 127, %v27_v1  ;;  %s129_s6 = sld [smem:[#allocation3 + $0x5]]  ;;  %s37_s7 = sld [smem:[#allocation3]] }
  0x21   :  { %s126_s8 = sld [smem:[#allocation3 + $0x2]]  ;;  %s128_s9 = sld [smem:[#allocation3 + $0x4]] }
  0x22   :  { %v29_v3 = vand.u32 1, %v28_v2  ;;  %s130_s10 = sld [smem:[#allocation3 + $0x6]]  ;;  %s131_s1 = sld [smem:[#allocation3 + $0x7]] }
  0x23   :  { %33 = vrot.lane.b32.xlu0 %v26_v0, %s217_s3  ;;  %s132_s11 = sld [smem:[#allocation3 + $0x8]]  ;;  %s133_s12 = sld [smem:[#allocation3 + $0x9]] }
  0x24   :  { %vm258_vm0 = vcmp.eq.s32.totalorder %v29_v3, 0  ;;  %s134_s13 = sld [smem:[#allocation3 + $0xc]]  ;;  %s135_s14 = sld [smem:[#allocation3 + $0xa]] }
  0x25   :  { %v48_v6 = vstv %s125_s4  ;;  %v59_v7 = vstv %s127_s5  ;;  %s136_s15 = sld [smem:[#allocation3 + $0xd]]  ;;  %s137_s16 = sld [smem:[#allocation3 + $0xb]] }
  0x26   :  { %v70_v9 = vstv %s129_s6  ;;  %v46_v10 = vstv %s37_s7  ;;  %s138_s17 = sld [smem:[#allocation3 + $0xe]]  ;;  %s139_s18 = sld [smem:[#allocation3 + $0xf]] }
  0x27   :  { %v57_v11 = vstv %s126_s8  ;;  %v68_v12 = vstv %s128_s9  ;;  %s140_s19 = sld [smem:[#allocation3 + $0x10]]  ;;  %s218_s20 = smov [#allocation7]  }
  0x28   :  { %v51_v21 = vstv %s130_s10  ;;  %v62_v22 = vstv %s131_s1  ;;  %s116_s21 = sshll.u32 %s218_s20, 4  ;;  %s117_s21 = int_to_ptr.vmem [resolvable:$true] %s116_s21 }
  0x29   :  { %v73_v23 = vstv %s132_s11  ;;  %v81_v33 = vstv %s133_s12  ;;  %s186_s22 = scalar_lea.vmem %s117_s21, 128  ;;  %p191_p12 = scmp.lt.s32.totalorder %s117_s21, %s117_s21 }
  0x2a   :  { %v82_v34 = vstv %s134_s13  ;;  %v86_v36 = vstv %s135_s14  ;;  %p187_p11 = scmp.ne.s32.totalorder %s117_s21, %s186_s22  ;;  %p192_p13 = scmp.lt.s32.totalorder %s186_s22, %s186_s22 }
  0x2b   :  { %v87_v37 = vstv %s136_s15  ;;  %v83_v42 = vsel %vm258_vm0, %v81_v33, %v82_v34  ;;  %v91_v43 = vstv %s137_s16 }
  0x2c   :  { %v92_v44 = vstv %s138_s17  ;;  %v88_v47 = vsel %vm258_vm0, %v86_v36, %v87_v37  ;;  %v96_v52 = vstv %s139_s18  ;;  %p193_p0 = por %p192_p13, %p191_p12 }
  0x2d   :  { %v93_v50 = vsel %vm258_vm0, %v91_v43, %v92_v44  ;;  %v97_v53 = vstv %s140_s19 }
  0x2e   :  { %v98_v57 = vsel %vm258_vm0, %v96_v52, %v97_v53  ;;  %p194_p1 = pnand %p193_p0, %p187_p11 }
  0x91   :  { %v32_v5 = vpop.permute.xlu0 %31 }
  0x92   :  { %v36_v8 = vsel %vm258_vm0, %v32_v5, %v26_v0 }
  0x93   :  { %v49_v14 = vmul.f32 %v48_v6, %v36_v8  ;;  %v60_v15 = vmul.f32 %v59_v7, %v36_v8  ;;  %v71_v17 = vmul.f32 %v70_v9, %v36_v8 }
  0x95   :  { %v34_v13 = vpop.permute.xlu0 %33 }
  0x96   :  { %v35_v16 = vsel %vm258_vm0, %v26_v0, %v34_v13 }
  0x97   :  { %v47_v18 = vmul.f32 %v46_v10, %v35_v16  ;;  %v58_v19 = vmul.f32 %v57_v11, %v35_v16  ;;  %v69_v20 = vmul.f32 %v68_v12, %v35_v16 }
  0x99   :  { %v50_v24 = vadd.f32 %v49_v14, %v47_v18  ;;  %v61_v25 = vadd.f32 %v60_v15, %v58_v19  ;;  %v72_v26 = vadd.f32 %v71_v17, %v69_v20 }
  0x9b   :  { %v52_v27 = vadd.f32 %v51_v21, %v50_v24  ;;  %v63_v28 = vadd.f32 %v62_v22, %v61_v25  ;;  %v74_v29 = vadd.f32 %v73_v23, %v72_v26 }
  0x9d   :  { %v53_v30 = vmul.f32 0.5, %v52_v27  ;;  %v64_v31 = vmul.f32 0.5, %v63_v28  ;;  %v75_v32 = vmul.f32 0.5, %v74_v29 }
  0x9f   :  { %146 = vtanh.f32 %v53_v30 }
  0xa0   :  { %148 = vtanh.f32 %v64_v31 }
  0xa1   :  { %150 = vtanh.f32 %v75_v32 }
  0xa9   :  { %v147_v35 = vpop.eup %146 }
  0xaa   :  { %v149_v38 = vpop.eup %148  ;;  %v55_v39 = vmul.f32 0.5, %v147_v35 }
  0xab   :  { %v151_v40 = vpop.eup %150  ;;  %v66_v41 = vmul.f32 0.5, %v149_v38 }
  0xac   :  { %v56_v45 = vadd.f32 0.5, %v55_v39  ;;  %v77_v46 = vmul.f32 0.5, %v151_v40 }
  0xad   :  { %v67_v48 = vadd.f32 0.5, %v66_v41 }
  0xae   :  { %v78_v49 = vadd.f32 0.5, %v77_v46  ;;  %v99_v51 = vmul.f32 %v83_v42, %v56_v45 }
  0xaf   :  { %v100_v54 = vmul.f32 %v88_v47, %v67_v48 }
  0xb0   :  { %v102_v56 = vmul.f32 %v93_v50, %v78_v49 }
  0xb1   :  { %v101_v55 = vadd.f32 %v100_v54, %v99_v51 }
  0xb3   :  { %v103_v58 = vadd.f32 %v102_v56, %v101_v55 }
  0xb5   :  { %v104_v59 = vadd.f32 %v103_v58, %v98_v57 }
  0xb7   :  { %v105_v60 = vmul.f32 0.5, %v104_v59 }
  0xb9   :  { %152 = vtanh.f32 %v105_v60 }
  0xc3   :  { %v153_v61 = vpop.eup %152 }
  0xc4   :  { %v107_v62 = vmul.f32 0.5, %v153_v61 }
  0xc6   :  { %v108_v63 = vadd.f32 0.5, %v107_v62 }
  0xc8   :  { %109 = vst [vmem:[#allocation7] sm:$0xff] %v108_v63 }
  0xc9   :  { %197 = shalt.err (!%p194_p1)
}
  0xca   :  { %s198_s25 = scalar_lea.hbm %s288_s2, 128 }
  0xcb   :  { %p199_p2 = scmp.ne.s32.totalorder %s288_s2, %s198_s25  ;;  %p202_p3 = scmp.lt.u32.totalorder %s198_s25, %s288_s2 }
  0xcd   :  { %p204_p4 = pnand %p202_p3, %p199_p2 }
  0xcf   :  { %207 = shalt.err (!%p204_p4)
}
  0xd0   :  { %119 = dma.vmem_to_hbm [thread:$0]  %s117_s21, 128, %s288_s2, [#allocation6]  }
  0xd1   :  { %212 = dma.done.wait [#allocation6], 128  }
  0xd2   :  { %213 = vsyncadd [#allocation6], 4294967168 }
  0xd3   :  { %123 = vsyncpa [#allocation5], 1 }
  0xd4   :  { %124 = vsyncpa [#allocation6], 1 }

</bundles_post_ra>
